<compile_context>
chip_gen: v6e
topology: v6e:2x2x1
jax: 0.10.0
libtpu: 0.0.40
codegen_flags: <defaults>
</compile_context>

<pallas_src>
import math
import jax
import jax.numpy as jnp
from jax import lax
from jax.experimental import pallas as pl
from jax.experimental.pallas import tpu as pltpu


def _make_pe(max_len: int, d_model: int) -> jnp.ndarray:
    """Sin/cos positional encoding identical to the PositionalEncoding2 buffer."""
    position = jnp.arange(max_len, dtype=jnp.float32)[:, None]             # (L, 1)
    div_term = jnp.exp(
        jnp.arange(0, d_model, 2, dtype=jnp.float32)
        * (-math.log(10000.0) / d_model)
    )                                                                       # (d_model/2,)
    pe = jnp.zeros((max_len, d_model), dtype=jnp.float32)
    pe = pe.at[:, 0::2].set(jnp.sin(position * div_term))
    pe = pe.at[:, 1::2].set(jnp.cos(position * div_term))
    return pe[None]                                                         # (1, L, d_model)


def _pick_seq_tile(S: int, target: int = 512) -> int:
    """Largest divisor of S that is <= target, preferring multiples of 8."""
    if S <= target:
        return S
    fallback = S
    for ts in range(target, 0, -1):
        if S % ts == 0:
            if ts % 8 == 0:
                return ts
            if fallback == S:
                fallback = ts
    return fallback


def _embed_pos_kernel(x_ref, w_ref, pe_ref, o_ref):
    # x_ref:  (TS, dim)        current (batch, seq-tile) slab of the input
    # w_ref:  (d_model, dim)   scaled weight, resident across the whole grid
    # pe_ref: (TS, d_model)    (pe + bias) * sqrt(multiplier), shared across batch
    # o_ref:  (TS, d_model)
    # out = x @ W^T  done natively by the MXU via dot_general (no transpose op).
    out = lax.dot_general(
        x_ref[...], w_ref[...],
        dimension_numbers=(((1,), (1,)), ((), ())),
        preferred_element_type=jnp.float32,
    )
    o_ref[...] = (out + pe_ref[...]).astype(o_ref.dtype)


def linear_embed_with_pos(x, weight, bias, pe, multiplier: float, seq_tile: int = 512):
    """x: (B, S, dim); weight: (d_model, dim) as in nn.Linear; bias: (d_model,);
    pe: (1, max_len, d_model)."""
    B, S, dim = x.shape
    d_model = weight.shape[0]
    assert S <= pe.shape[1], "sequence length exceeds positional-encoding max_len"

    scale = math.sqrt(multiplier)
    # Fold scalar math into the operands (done once, outside the kernel):
    #   (x @ W^T + b + pe) * s  ==  x @ (W*s)^T + (pe + b)*s
    w_scaled = (weight * scale).astype(jnp.float32)                    # (d_model, dim)
    pe_bias = ((pe[0, :S, :] + bias[None, :]) * scale).astype(jnp.float32)  # (S, d_model)

    TS = _pick_seq_tile(S, seq_tile)
    grid = (B, S // TS)

    # Rough per-step VMEM footprint (double-buffered x/pe/out + resident weight).
    isz = jnp.dtype(x.dtype).itemsize
    vmem_est = (2 * TS * dim * isz          # x
                + 2 * TS * d_model * 4      # pe_bias
                + 2 * TS * d_model * isz    # out
                + d_model * dim * 4)        # weight (resident)
    vmem_limit = int(min(max(2 * vmem_est + (2 << 20), 32 << 20), 100 << 20))

    cost = pl.CostEstimate(
        flops=2 * B * S * dim * d_model,
        transcendentals=0,
        bytes_accessed=(B * S * dim * isz
                        + d_model * dim * 4
                        + S * d_model * 4
                        + B * S * d_model * isz),
    )

    # NOTE: output last dim is d_model; keep it a multiple of 128 in real
    # deployments for lane-dense (unmasked) stores. For sub-128 d_model the
    # block equals the full array dim, which is still valid (just padded).
    return pl.pallas_call(
        _embed_pos_kernel,
        out_shape=jax.ShapeDtypeStruct((B, S, d_model), x.dtype),
        grid_spec=pltpu.PrefetchScalarGridSpec(
            num_scalar_prefetch=0,
            grid=grid,
            in_specs=[
                # x: one (TS, dim) slab per (batch, seq-tile) step.
                pl.BlockSpec((pl.Squeezed(), TS, dim), lambda b, s: (b, s, 0)),
                # weight: constant in both grid axes -> stays resident in VMEM.
                pl.BlockSpec((d_model, dim), lambda b, s: (0, 0)),
                # (pe + bias) * scale: varies only along the sequence axis.
                pl.BlockSpec((TS, d_model), lambda b, s: (s, 0)),
            ],
            out_specs=pl.BlockSpec(
                (pl.Squeezed(), TS, d_model), lambda b, s: (b, s, 0)
            ),
        ),
        compiler_params=pltpu.CompilerParams(
            dimension_semantics=("parallel", "parallel"),
            vmem_limit_bytes=vmem_limit,
        ),
        cost_estimate=cost,
    )(x, w_scaled, pe_bias)


if __name__ == "__main__":
    # Small shapes consistent with the module's forward: (B, S, dim) -> (B, S, d_model).
    B, S, dim, d_model = 2, 8, 4, 32
    max_len = 16
    multiplier = 2.0

    key = jax.random.PRNGKey(0)
    kx, kw, kb = jax.random.split(key, 3)

    # Deterministic parameter init (mimics nn.Linear uniform(-1/sqrt(dim), 1/sqrt(dim))).
    bound = 1.0 / math.sqrt(dim)
    weight = jax.random.uniform(kw, (d_model, dim), jnp.float32, -bound, bound)
    bias = jax.random.uniform(kb, (d_model,), jnp.float32, -bound, bound)
    pe = _make_pe(max_len, d_model)

    x = jax.random.normal(kx, (B, S, dim), jnp.float32)

    out = linear_embed_with_pos(x, weight, bias, pe, multiplier)
    out = jax.block_until_ready(out)

    # Reference check in plain JAX (matches the PyTorch forward).
    ref = (x @ weight.T + bias + pe[:, :S, :]) * math.sqrt(multiplier)
    assert out.shape == (B, S, d_model)
    assert jnp.allclose(out, ref, atol=1e-5, rtol=1e-5), "mismatch vs reference"

    print("KERNEL_OK")
</pallas_src>

<mosaic_0001>
module attributes {stable_mosaic.version = 11 : i64} {
  func.func @_embed_pos_kernel(%arg0: i32, %arg1: i32, %arg2: memref<1x8x4xf32, #tpu.memory_space<vmem>>, %arg3: memref<32x4xf32, #tpu.memory_space<vmem>>, %arg4: memref<8x32xf32, #tpu.memory_space<vmem>>, %arg5: memref<1x8x32xf32, #tpu.memory_space<vmem>>) attributes {dimension_semantics = [#tpu.dimension_semantics<parallel>, #tpu.dimension_semantics<parallel>], iteration_bounds = array<i64: 2, 1>, scalar_prefetch = 0 : i64, scratch_operands = 0 : i64, tpu.core_type = #tpu.core_type<tc>, window_params = [{transform_indices = @transform_0, window_bounds = array<i64: 1, 8, 4>}, {pipeline_mode = #tpu.pipeline_mode<synchronous>, transform_indices = @transform_1, window_bounds = array<i64: 32, 4>}, {transform_indices = @transform_2, window_bounds = array<i64: 8, 32>}, {transform_indices = @transform_3, window_bounds = array<i64: 1, 8, 32>}]} {
    %c0 = arith.constant 0 : index
    %c0_0 = arith.constant 0 : index
    %c0_1 = arith.constant 0 : index
    %0 = vector.load %arg2[%c0, %c0_0, %c0_1] : memref<1x8x4xf32, #tpu.memory_space<vmem>>, vector<1x8x4xf32>
    %1 = vector.shape_cast %0 : vector<1x8x4xf32> to vector<8x4xf32>
    %c0_2 = arith.constant 0 : index
    %c0_3 = arith.constant 0 : index
    %2 = vector.load %arg3[%c0_2, %c0_3] : memref<32x4xf32, #tpu.memory_space<vmem>>, vector<32x4xf32>
    %cst = arith.constant dense<0.000000e+00> : vector<8x32xf32>
    %3 = tpu.matmul %1, %2, %cst {dimension_numbers = #tpu.dot_dimension_numbers<[1], [1], [0], [0], [0, 0, 1, 0], [], []>} : vector<8x4xf32>, vector<32x4xf32>, vector<8x32xf32> -> vector<8x32xf32>
    %c0_4 = arith.constant 0 : index
    %c0_5 = arith.constant 0 : index
    %4 = vector.load %arg4[%c0_4, %c0_5] : memref<8x32xf32, #tpu.memory_space<vmem>>, vector<8x32xf32>
    %5 = arith.addf %3, %4 : vector<8x32xf32>
    %c0_6 = arith.constant 0 : index
    %c0_7 = arith.constant 0 : index
    %c0_8 = arith.constant 0 : index
    %6 = vector.load %arg5[%c0_6, %c0_7, %c0_8] : memref<1x8x32xf32, #tpu.memory_space<vmem>>, vector<1x8x32xf32>
    %7 = vector.shape_cast %6 : vector<1x8x32xf32> to vector<8x32xf32>
    %8 = vector.shape_cast %5 : vector<8x32xf32> to vector<1x8x32xf32>
    tpu.vector_store %arg5[%c0_6, %c0_7, %c0_8], %8 {strides = array<i32>} : memref<1x8x32xf32, #tpu.memory_space<vmem>>, vector<1x8x32xf32>,
    return
  }
  func.func @transform_0(%arg0: i32, %arg1: i32) -> (i32, i32, i32) {
    %c0_i32 = arith.constant 0 : i32
    %c0_i32_0 = arith.constant 0 : i32
    return %arg0, %arg1, %c0_i32 : i32, i32, i32
  }
  func.func @transform_1(%arg0: i32, %arg1: i32) -> (i32, i32) {
    %c0_i32 = arith.constant 0 : i32
    %c0_i32_0 = arith.constant 0 : i32
    %c0_i32_1 = arith.constant 0 : i32
    return %c0_i32, %c0_i32_0 : i32, i32
  }
  func.func @transform_2(%arg0: i32, %arg1: i32) -> (i32, i32) {
    %c0_i32 = arith.constant 0 : i32
    %c0_i32_0 = arith.constant 0 : i32
    return %arg1, %c0_i32 : i32, i32
  }
  func.func @transform_3(%arg0: i32, %arg1: i32) -> (i32, i32, i32) {
    %c0_i32 = arith.constant 0 : i32
    %c0_i32_0 = arith.constant 0 : i32
    return %arg0, %arg1, %c0_i32 : i32, i32, i32
  }
}

</mosaic_0001>

<bundles_post_ra>
// kernel: tpu_custom_call.1
= control target key start
LH: loop header
LB: loop body
LE: loop exit
PB: predicated region body
PF: predicated region fallthrough
CT: control target
= control target key end

     0   :  { %8 = vsyncpa [#allocation3], 0  ;;  %s719_s0 = inlined_call_operand.vmem [shape: f32[2,8,4], index: 0, kind: input, shape index: {}]   ;;  %s720_s1 = inlined_call_operand.vmem [shape: f32[32,4], index: 1, kind: input, shape index: {}]   ;;  %s721_s2 = inlined_call_operand.vmem [shape: f32[8,32], index: 2, kind: input, shape index: {}]   ;;  %s722_s3 = inlined_call_operand.hbm [shape: f32[2,8,32], index: 3, kind: output, shape index: {}]  }
   0x1   :  { %10 = vsyncpa [#allocation3 + $0x1], 0  ;;  %s594_s12 = smov 0   ;;  %s596_s13 = smov 0  }
   0x2   :  { %s598_s14 = smov 0   ;;  %s600_s15 = smov 0  }
   0x3   :  { %s602_s16 = smov 0   ;;  %s604_s17 = smov 0  }
   0x4 LB: > { %s403_s18 = sadd.s32 4294967295, %s569_s17   ;;  %s404_s19 = sadd.s32 4294967294, %s569_s17   ;;  %s569_s17 = sphi %s604_s17, %s16_s17   ;;  %s565_s16 = sphi %s602_s16, %s729_s16   ;;  %s561_s15 = sphi %s600_s15, %s728_s15   ;;  %s557_s14 = sphi %s598_s14, %s727_s14   ;;  %s553_s13 = sphi %s596_s13, %s726_s13   ;;  %s549_s12 = sphi %s594_s12, %s725_s12  }
   0x5   : > { %s28_s20 = sadd.s32 1, %s565_s16  ;;  %s112_s21 = sadd.s32 1, %s557_s14 }
   0x6   : > { %p30_p0 = scmp.ge.s32.totalorder %s28_s20, 2  ;;  %p122_p1 = scmp.ne.s32.totalorder %s557_s14, %s553_s13 }
   0x7   : > { %p123_p2 = scmp.eq.s32.totalorder %s403_s18, 1  ;;  %p128_p3 = scmp.ne.s32.totalorder %s553_s13, %s549_s12 }
   0x8   : > { %s731_s20 = smov (%p30_p0, %s28_s20), 0  ;;  %p129_p5 = scmp.eq.s32.totalorder %s404_s19, 1 }
   0x9   : > { %p634_p4 = por %p123_p2, %p122_p1  ;;  %s107_s23 = ssub.s32 %s565_s16, %s731_s20 }
   0xa   : > { %p408_p6 = scmp.ge.s32.totalorder %s569_s17, 1  ;;  %p110_p7 = scmp.eq.s32.totalorder %s107_s23, 0 }
   0xb   : > { %p641_p8 = por %p129_p5, %p128_p3  ;;  %p167_p9 = scmp.lt.s32.totalorder %s569_s17, 3 }
   0xc   : > { %s647_s25 = scalar_select %p110_p7, %s557_s14, %s112_s21  }
   0xd   : > { %p168_p10 = pnand %p408_p6, %p167_p9 }
   0xe   : > { %p197_p11 = scmp.lt.s32.totalorder (!%p168_p10), %s561_s15, 1  ;;  %s194_s18 = sand.u32 (!%p168_p10), 1, %s553_s13  }
   0xf   : > { %171 = sbr.rel (%p168_p10) target bundleno = 245 (0xf5), region = 32  ;;  %s409_s19 = sshll.u32 (!%p168_p10), %s194_s18, 3 }
  0x10   : > { %s417_s26 = sshll.u32 (!%p168_p10), %s561_s15, 7  ;;  %s196_s27 = scalar_lea.vmem (!%p168_p10), [#allocation2], %s409_s19 }
  0x11   : > { %s317_s28 = sshll.u32 (!%p168_p10), %s196_s27, 4  ;;  %s679_s4 = scalar_lea.hbm (!%p168_p10), %s722_s3, %s417_s26  ;;  %s318_s28 = int_to_ptr.vmem [resolvable:$true] %s317_s28 }
  0x12   : > { %s303_s5 = scalar_lea.sflag (!%p168_p10), [#allocation3], %s194_s18 }
  0x14   : > { %v212_v0 = vld [vmem:[%s720_s1 + $0x18] sm:$0xff]  ;;  %vm214_vm0 = vcmask 31744   ;;  %v571_v1 = vmov 0.0   ;;  %vm572_vm1 = vmmov 0   ;;  %v211_v2 = vld [vmem:[%s720_s1 + $0x10] sm:$0xff]  ;;  %s198_s30 = scalar_select %p197_p11, %s561_s15, 1 }
  0x15   : > { %425 = vmatprep.subr.mxu0 %v571_v1  ;;  %433 = vmatprep.mubr.msk.f32.mxu0 %vm572_vm1, %v571_v1  ;;  %v210_v3 = vld [vmem:[%s720_s1 + $0x8] sm:$0xff]  ;;  %v209_v4 = vld [vmem:[%s720_s1] sm:$0xff]  ;;  %vm300_vm2 = vcmask 261120   ;;  %s573_s15 = smov [#allocation2]  }
  0x16   : > { %426 = vmatpush3.xpose.msk.msra.mxu0 %vm214_vm0, %v212_v0  ;;  %s410_s6 = sshll.u32 %s198_s30, 3  ;;  %v213_v6 = vld [vmem:[%s721_s2] sm:$0xff]  ;;  %s497_s7 = sshll.u32 %s573_s15, 4  ;;  %s498_s7 = int_to_ptr.vmem [resolvable:$false] %s497_s7 }
  0x17   : > { %427 = vmatprep.subr.mxu0 %v571_v1  ;;  %s203_s11 = scalar_lea.vmem %s719_s0, %s410_s6  ;;  %s493_s6 = scalar_lea.vmem %s318_s28, 128 }
  0x18   : > { %v208_v5 = vld [vmem:[%s203_s11] sm:$0xff]  ;;  %p494_p12 = scmp.ne.s32.totalorder %s318_s28, %s493_s6  ;;  %s499_s8 = scalar_lea.vmem %s498_s7, 256 }
  0x19   : > { %p500_p1 = scmp.lt.s32.totalorder %s318_s28, %s498_s7  ;;  %p501_p2 = scmp.lt.s32.totalorder %s499_s8, %s493_s6 }
  0x1a   : > { %428 = vmatpush3.xpose.msk.msra.mxu0 %vm214_vm0, %v211_v2  ;;  %p495_p13 = pnand %p494_p12, %p634_p4 }
  0x1b   : > { %429 = vmatprep.subr.mxu0 %v571_v1  ;;  %p502_p3 = por %p501_p2, %p500_p1 }
  0x1c   : > { %p496_p0 = pneg %p495_p13 }
  0x1e   : > { %430 = vmatpush3.xpose.msk.msra.mxu0 %vm214_vm0, %v210_v3  ;;  %p503_p5 = pnand %p502_p3, %p496_p0 }
  0x1f   : > { %431 = vmatprep.subr.mxu0 %v571_v1 }
  0x22   : > { %432 = vmatpush3.xpose.msk.msra.mxu0 %vm214_vm0, %v209_v4 }
  0x25   : > { %434 = vmatmul.mubr.msk.f32.vlgmr.msra.gmra.mxu0 %vm214_vm0, %v208_v5 }
  0xe5   : > { %v296_v7 = vpop.f32.mrf.mxu0 }
  0xe6   : > { %v297_v8 = vadd.f32 %v296_v7, %v213_v6 }
  0xe7   : > { %v435_v9 = vpop.f32.mrf.mxu0 }
  0xe8   : > { %301 = vst.msk [vmem:[%s196_s27] sm:$0xff] %vm300_vm2, %v297_v8 }
  0xe9   : > { %506 = shalt.err (!%p503_p5)
}
  0xea   : > { %s507_s9 = scalar_lea.hbm %s679_s4, 128  ;;  %s511_s18 = scalar_lea.hbm %s722_s3, 256 }
  0xeb   : > { %p508_p6 = scmp.ne.s32.totalorder %s679_s4, %s507_s9  ;;  %p512_p10 = scmp.lt.s32.totalorder %s679_s4, %s722_s3 }
  0xec   : > { %p513_p11 = scmp.lt.s32.totalorder %s511_s18, %s507_s9 }
  0xed   : > { %p509_p7 = pnand %p508_p6, %p634_p4 }
  0xee   : > { %p514_p12 = por %p513_p11, %p512_p10 }
  0xef   : > { %p510_p9 = pneg %p509_p7 }
  0xf1   : > { %p515_p13 = pnand %p514_p12, %p510_p9 }
  0xf3   : > { %518 = shalt.err (!%p515_p13)
}
  0xf4   : > { %436 = dma.vmem_to_hbm [thread:$0]  (%p634_p4), %s318_s28, 128, %s679_s4, %s303_s5  }
  0xf5 PF: > { %p442_p0 = scmp.ge.s32.totalorder %s569_s17, 2  ;;  %s329_s23 = sand.u32 1, %s549_s12  }
  0xf6   : > { %s330_s26 = scalar_lea.sflag [#allocation3], %s329_s23 }
  0xf7   : > { %p439_p1 = pnand %p442_p0, %p641_p8 }
  0xf9   : > { %p440_p2 = pneg %p439_p1 }
  0xfb   : > { %544 = dma.done.wait (%p440_p2), %s330_s26, 128  }
  0xfc   : > { %546 = vsyncadd (%p440_p2), %s330_s26, 4294967168  ;;  %s16_s17 = sadd.s32 1, %s569_s17   ;;  %s725_s12 = smov %s553_s13 }
  0xfd   : > { %p13_p3 = scmp.ge.s32.totalorder %s16_s17, 4   ;;  %s726_s13 = smov %s557_s14 }
  0xfe   : > { %s727_s14 = smov %s647_s25  ;;  %s728_s15 = smov %s565_s16 }
  0xff   : > { %s729_s16 = smov %s731_s20  ;;  %15 = sbr.rel (!%p13_p3) target bundleno = 4 (0x4), region = 70 }
 0x104   :  { %335 = vsyncpa [#allocation3], 1 }
 0x105   :  { %337 = vsyncpa [#allocation3 + $0x1], 1 }

</bundles_post_ra>
